<compile_context>
chip_gen: v7x
topology: tpu7x:2x2x1
jax: 0.10.0
libtpu: 0.0.40
codegen_flags: <defaults>
</compile_context>

<pallas_src>
import functools

import jax
import jax.numpy as jnp
from jax import lax
from jax.experimental import pallas as pl
from jax.experimental.pallas import tpu as pltpu


# ---------------------------------------------------------------------------
# Fast path: tables resident in VMEM, gathers as one-hot MXU matmuls.
# ---------------------------------------------------------------------------
def skipgram_vmem_kernel(
    # inputs (VMEM blocks)
    pos_u_ref, pos_v_ref, neg_v_ref, pos_u_rep_ref,   # (bB,1) / (bB*N,1) int32
    u_tbl_ref, v_tbl_ref,                             # (V, D), resident
    # output
    out_ref,                                          # (1, 8, 128) partial sum
    *, block_b, n_neg, batch, vocab,
):
    t = pl.program_id(0)
    base = t * block_b

    u_tbl = u_tbl_ref[...].astype(jnp.float32)        # (V, D)
    v_tbl = v_tbl_ref[...].astype(jnp.float32)        # (V, D)

    pu = pos_u_ref[...]                               # (bB, 1) int32
    pv = pos_v_ref[...]                               # (bB, 1) int32
    nv = neg_v_ref[...]                               # (bB*N, 1) int32
    pur = pos_u_rep_ref[...]                          # (bB*N, 1) int32

    iota_b = lax.broadcasted_iota(jnp.int32, (block_b, vocab), 1)
    iota_bn = lax.broadcasted_iota(jnp.int32, (block_b * n_neg, vocab), 1)

    # one-hot gathers on the MXU
    u = jnp.dot((iota_b == pu).astype(jnp.float32), u_tbl,
                preferred_element_type=jnp.float32)            # (bB, D)
    v = jnp.dot((iota_b == pv).astype(jnp.float32), v_tbl,
                preferred_element_type=jnp.float32)            # (bB, D)
    u_rep = jnp.dot((iota_bn == pur).astype(jnp.float32), u_tbl,
                    preferred_element_type=jnp.float32)        # (bB*N, D)
    neg = jnp.dot((iota_bn == nv).astype(jnp.float32), v_tbl,
                  preferred_element_type=jnp.float32)          # (bB*N, D)

    # Ragged-last-tile masks (flat negatives: row b*N+n valid iff b < batch-base).
    row_b = lax.broadcasted_iota(jnp.int32, (block_b, 1), 0)
    valid_b = (row_b < (batch - base)).astype(jnp.float32)
    row_bn = lax.broadcasted_iota(jnp.int32, (block_b * n_neg, 1), 0)
    valid_bn = (row_bn < (batch - base) * n_neg).astype(jnp.float32)

    # positives: -logsigmoid(clip(<u, v>)) = log1p(exp(-score))
    pos_score = jnp.clip(jnp.sum(u * v, axis=1, keepdims=True), -10.0, 10.0)
    pos_loss = jnp.log1p(jnp.exp(-pos_score)) * valid_b

    # negatives: -logsigmoid(-clip(<neg, u>)) = log1p(exp(score))
    neg_score = jnp.clip(jnp.sum(neg * u_rep, axis=1, keepdims=True), -10.0, 10.0)
    neg_loss = jnp.log1p(jnp.exp(neg_score)) * valid_bn

    partial = jnp.sum(pos_loss) + jnp.sum(neg_loss)
    # Lane-dense unmasked store; the wrapper reads [:, 0, 0].
    out_ref[...] = jnp.full((1, 8, 128), partial, dtype=jnp.float32)


# ---------------------------------------------------------------------------
# Large-vocab path: tables in HBM, per-row DMA gather (unchanged from v2).
# ---------------------------------------------------------------------------
def skipgram_hbm_kernel(
    # scalar-prefetch refs (SMEM)
    pos_u_ref, pos_v_ref, neg_v_ref,
    # inputs (HBM, memory_space=pl.ANY)
    u_tbl, v_tbl,
    # output (VMEM)
    out_ref,
    # scratch
    u_buf, v_buf, neg_buf, sem,
    *, block_b, n_neg, batch,
):
    t = pl.program_id(0)
    base = t * block_b

    # fused gather: DMA exactly the rows this batch tile needs
    copies = []
    for r in range(block_b):
        copies.append(pltpu.make_async_copy(
            u_tbl.at[pl.ds(pos_u_ref[base + r], 1), :],
            u_buf.at[pl.ds(r, 1), :],
            sem.at[0]))
        copies.append(pltpu.make_async_copy(
            v_tbl.at[pl.ds(pos_v_ref[base + r], 1), :],
            v_buf.at[pl.ds(r, 1), :],
            sem.at[0]))
        for n in range(n_neg):
            copies.append(pltpu.make_async_copy(
                v_tbl.at[pl.ds(neg_v_ref[(base + r) * n_neg + n], 1), :],
                neg_buf.at[r, pl.ds(n, 1), :],
                sem.at[0]))
    for c in copies:
        c.start()
    for c in copies:
        c.wait()

    u = u_buf[...].astype(jnp.float32)        # (bB, D)
    v = v_buf[...].astype(jnp.float32)        # (bB, D)
    neg = neg_buf[...].astype(jnp.float32)    # (bB, N, D)

    loc = lax.broadcasted_iota(jnp.int32, (block_b, 1), 0)
    valid = (loc < (batch - base)).astype(jnp.float32)   # (bB, 1)

    pos_score = jnp.clip(jnp.sum(u * v, axis=1, keepdims=True), -10.0, 10.0)
    pos_loss = jnp.log1p(jnp.exp(-pos_score)) * valid

    neg_score = jnp.clip(jnp.sum(neg * u[:, None, :], axis=2), -10.0, 10.0)
    neg_loss = jnp.log1p(jnp.exp(neg_score)) * valid     # mask broadcasts over N

    partial = jnp.sum(pos_loss) + jnp.sum(neg_loss)
    out_ref[...] = jnp.full((1, 8, 128), partial, dtype=jnp.float32)


# ---------------------------------------------------------------------------
# Wrapper
# ---------------------------------------------------------------------------
def skipgram_forward(u_weight, v_weight, pos_u, pos_v, neg_v, *, block_b=8,
                     force_hbm_gather=False):
    """Forward pass of SkipGramModel: mean over batch of the NEG-sampling loss."""
    B = pos_u.shape[0]
    N = neg_v.shape[1]
    V, D = u_weight.shape

    block_b = max(1, min(block_b, B))
    # Keep the batch-tile sublane-friendly when the batch is actually tiled.
    if block_b < B and block_b % 8 != 0:
        block_b = max(8, (block_b // 8) * 8)
        block_b = min(block_b, B)
    num_tiles = pl.cdiv(B, block_b)
    pad = num_tiles * block_b - B

    pos_u_p = jnp.pad(pos_u.astype(jnp.int32), (0, pad))
    pos_v_p = jnp.pad(pos_v.astype(jnp.int32), (0, pad))
    neg_v_p = jnp.pad(neg_v.astype(jnp.int32), ((0, pad), (0, 0)))

    # Fast path whenever both tables comfortably fit in VMEM.
    table_f32_bytes = 2 * V * D * 4
    use_vmem = (not force_hbm_gather) and table_f32_bytes <= (4 << 20) and V <= 4096

    if use_vmem:
        pos_u_col = pos_u_p.reshape(-1, 1)                 # (T*bB, 1)
        pos_v_col = pos_v_p.reshape(-1, 1)                 # (T*bB, 1)
        neg_v_col = neg_v_p.reshape(-1, 1)                 # (T*bB*N, 1)
        pos_u_rep = jnp.repeat(pos_u_p, N).reshape(-1, 1)  # (T*bB*N, 1)

        kernel = functools.partial(
            skipgram_vmem_kernel, block_b=block_b, n_neg=N, batch=B, vocab=V)

        partials = pl.pallas_call(
            kernel,
            out_shape=jax.ShapeDtypeStruct((num_tiles, 8, 128), jnp.float32),
            grid_spec=pltpu.PrefetchScalarGridSpec(
                num_scalar_prefetch=0,
                grid=(num_tiles,),
                in_specs=[
                    pl.BlockSpec((block_b, 1), lambda t: (t, 0)),
                    pl.BlockSpec((block_b, 1), lambda t: (t, 0)),
                    pl.BlockSpec((block_b * N, 1), lambda t: (t, 0)),
                    pl.BlockSpec((block_b * N, 1), lambda t: (t, 0)),
                    pl.BlockSpec((V, D), lambda t: (0, 0)),   # u table, resident
                    pl.BlockSpec((V, D), lambda t: (0, 0)),   # v table, resident
                ],
                out_specs=pl.BlockSpec((1, 8, 128), lambda t: (t, 0, 0)),
            ),
            compiler_params=pltpu.CompilerParams(
                dimension_semantics=("parallel",)),
        )(pos_u_col, pos_v_col, neg_v_col, pos_u_rep, u_weight, v_weight)
    else:
        neg_v_flat = neg_v_p.reshape(-1)
        kernel = functools.partial(
            skipgram_hbm_kernel, block_b=block_b, n_neg=N, batch=B)

        partials = pl.pallas_call(
            kernel,
            out_shape=jax.ShapeDtypeStruct((num_tiles, 8, 128), jnp.float32),
            grid_spec=pltpu.PrefetchScalarGridSpec(
                num_scalar_prefetch=3,
                grid=(num_tiles,),
                in_specs=[
                    pl.BlockSpec(memory_space=pl.ANY),   # u_embeddings table (HBM)
                    pl.BlockSpec(memory_space=pl.ANY),   # v_embeddings table (HBM)
                ],
                out_specs=pl.BlockSpec((1, 8, 128),
                                       lambda t, pu, pv, nv: (t, 0, 0)),
                scratch_shapes=[
                    pltpu.VMEM((block_b, D), u_weight.dtype),     # gathered emb_u
                    pltpu.VMEM((block_b, D), v_weight.dtype),     # gathered emb_v
                    pltpu.VMEM((block_b, N, D), v_weight.dtype),  # gathered emb_neg_v
                    pltpu.SemaphoreType.DMA((1,)),
                ],
            ),
            compiler_params=pltpu.CompilerParams(
                dimension_semantics=("parallel",)),
        )(pos_u_p, pos_v_p, neg_v_flat, u_weight, v_weight)

    return jnp.sum(partials[:, 0, 0]) / B


def reference_forward(u_weight, v_weight, pos_u, pos_v, neg_v):
    emb_u = jnp.take(u_weight, pos_u, axis=0)
    emb_v = jnp.take(v_weight, pos_v, axis=0)
    emb_neg_v = jnp.take(v_weight, neg_v, axis=0)
    score = jnp.sum(emb_u * emb_v, axis=1)
    score = jnp.clip(score, -10.0, 10.0)
    score = -jax.nn.log_sigmoid(score)
    neg_score = jnp.einsum("bnd,bd->bn", emb_neg_v, emb_u)
    neg_score = jnp.clip(neg_score, -10.0, 10.0)
    neg_score = -jnp.sum(jax.nn.log_sigmoid(-neg_score), axis=1)
    return jnp.mean(score + neg_score)


if __name__ == "__main__":
    emb_size = 50        # vocabulary size
    emb_dimension = 32   # embedding dimension
    B = 32               # batch size
    N = 8                # negatives per positive
    block_b = 8          # -> grid of 4 batch tiles

    key = jax.random.PRNGKey(0)
    k_u, k_pu, k_pv, k_nv, k_v = jax.random.split(key, 5)

    initrange = 1.0 / emb_dimension
    # init.uniform_(u_embeddings.weight, -initrange, initrange)
    u_weight = jax.random.uniform(
        k_u, (emb_size, emb_dimension), jnp.float32, -initrange, initrange)
    # init.constant_(v_embeddings.weight, 0)
    v_weight = jnp.zeros((emb_size, emb_dimension), jnp.float32)

    pos_u = jax.random.randint(k_pu, (B,), 0, emb_size, dtype=jnp.int32)
    pos_v = jax.random.randint(k_pv, (B,), 0, emb_size, dtype=jnp.int32)
    neg_v = jax.random.randint(k_nv, (B, N), 0, emb_size, dtype=jnp.int32)

    # Fast (VMEM one-hot) path, zero v table (PyTorch init).
    loss = jax.block_until_ready(
        skipgram_forward(u_weight, v_weight, pos_u, pos_v, neg_v, block_b=block_b))
    ref = reference_forward(u_weight, v_weight, pos_u, pos_v, neg_v)
    assert jnp.allclose(loss, ref, rtol=1e-5, atol=1e-5), (loss, ref)

    # Nonzero v table exercises the full math path.
    v_weight2 = jax.random.uniform(
        k_v, (emb_size, emb_dimension), jnp.float32, -initrange, initrange)
    loss2 = jax.block_until_ready(
        skipgram_forward(u_weight, v_weight2, pos_u, pos_v, neg_v, block_b=block_b))
    ref2 = reference_forward(u_weight, v_weight2, pos_u, pos_v, neg_v)
    assert jnp.allclose(loss2, ref2, rtol=1e-5, atol=1e-5), (loss2, ref2)

    # Ragged batch (exercises the last-tile mask), fast path.
    Bq = 27
    loss3 = jax.block_until_ready(
        skipgram_forward(u_weight, v_weight2, pos_u[:Bq], pos_v[:Bq], neg_v[:Bq],
                         block_b=block_b))
    ref3 = reference_forward(u_weight, v_weight2, pos_u[:Bq], pos_v[:Bq], neg_v[:Bq])
    assert jnp.allclose(loss3, ref3, rtol=1e-5, atol=1e-5), (loss3, ref3)

    # Large-vocab (HBM DMA-gather) path, forced, full + ragged batch.
    loss4 = jax.block_until_ready(
        skipgram_forward(u_weight, v_weight2, pos_u, pos_v, neg_v,
                         block_b=block_b, force_hbm_gather=True))
    assert jnp.allclose(loss4, ref2, rtol=1e-5, atol=1e-5), (loss4, ref2)
    loss5 = jax.block_until_ready(
        skipgram_forward(u_weight, v_weight2, pos_u[:Bq], pos_v[:Bq], neg_v[:Bq],
                         block_b=block_b, force_hbm_gather=True))
    assert jnp.allclose(loss5, ref3, rtol=1e-5, atol=1e-5), (loss5, ref3)

    print("KERNEL_OK")
</pallas_src>

<mosaic_0001>
module attributes {stable_mosaic.version = 11 : i64} {
  func.func @skipgram_vmem_kernel(%arg0: i32, %arg1: memref<8x1xi32, #tpu.memory_space<vmem>>, %arg2: memref<8x1xi32, #tpu.memory_space<vmem>>, %arg3: memref<64x1xi32, #tpu.memory_space<vmem>>, %arg4: memref<64x1xi32, #tpu.memory_space<vmem>>, %arg5: memref<50x32xf32, #tpu.memory_space<vmem>>, %arg6: memref<50x32xf32, #tpu.memory_space<vmem>>, %arg7: memref<1x8x128xf32, #tpu.memory_space<vmem>>) attributes {dimension_semantics = [#tpu.dimension_semantics<parallel>], iteration_bounds = array<i64: 4>, scalar_prefetch = 0 : i64, scratch_operands = 0 : i64, tpu.core_type = #tpu.core_type<tc>, window_params = [{transform_indices = @transform_0, window_bounds = array<i64: 8, 1>}, {transform_indices = @transform_1, window_bounds = array<i64: 8, 1>}, {transform_indices = @transform_2, window_bounds = array<i64: 64, 1>}, {transform_indices = @transform_3, window_bounds = array<i64: 64, 1>}, {pipeline_mode = #tpu.pipeline_mode<synchronous>, transform_indices = @transform_4, window_bounds = array<i64: 50, 32>}, {pipeline_mode = #tpu.pipeline_mode<synchronous>, transform_indices = @transform_5, window_bounds = array<i64: 50, 32>}, {transform_indices = @transform_6, window_bounds = array<i64: 1, 8, 128>}]} {
    %c8_i32 = arith.constant 8 : i32
    %0 = arith.muli %arg0, %c8_i32 : i32
    %c0 = arith.constant 0 : index
    %c0_0 = arith.constant 0 : index
    %1 = vector.load %arg5[%c0, %c0_0] : memref<50x32xf32, #tpu.memory_space<vmem>>, vector<50x32xf32>
    %c0_1 = arith.constant 0 : index
    %c0_2 = arith.constant 0 : index
    %2 = vector.load %arg6[%c0_1, %c0_2] : memref<50x32xf32, #tpu.memory_space<vmem>>, vector<50x32xf32>
    %c0_3 = arith.constant 0 : index
    %c0_4 = arith.constant 0 : index
    %3 = vector.load %arg1[%c0_3, %c0_4] : memref<8x1xi32, #tpu.memory_space<vmem>>, vector<8x1xi32>
    %c0_5 = arith.constant 0 : index
    %c0_6 = arith.constant 0 : index
    %4 = vector.load %arg2[%c0_5, %c0_6] : memref<8x1xi32, #tpu.memory_space<vmem>>, vector<8x1xi32>
    %c0_7 = arith.constant 0 : index
    %c0_8 = arith.constant 0 : index
    %5 = vector.load %arg3[%c0_7, %c0_8] : memref<64x1xi32, #tpu.memory_space<vmem>>, vector<64x1xi32>
    %c0_9 = arith.constant 0 : index
    %c0_10 = arith.constant 0 : index
    %6 = vector.load %arg4[%c0_9, %c0_10] : memref<64x1xi32, #tpu.memory_space<vmem>>, vector<64x1xi32>
    %7 = tpu.iota {dimensions = array<i32: 1>} : vector<8x50xi32>
    %8 = tpu.iota {dimensions = array<i32: 1>} : vector<64x50xi32>
    %9 = vector.broadcast %3 : vector<8x1xi32> to vector<8x50xi32>
    %10 = arith.cmpi eq, %7, %9 : vector<8x50xi32>
    %11 = arith.extui %10 : vector<8x50xi1> to vector<8x50xi32>
    %12 = arith.sitofp %11 : vector<8x50xi32> to vector<8x50xf32>
    %cst = arith.constant dense<0.000000e+00> : vector<8x32xf32>
    %13 = tpu.matmul %12, %1, %cst {dimension_numbers = #tpu.dot_dimension_numbers<[1], [0], [0], [1], [0, 0, 1, 1], [], []>} : vector<8x50xf32>, vector<50x32xf32>, vector<8x32xf32> -> vector<8x32xf32>
    %14 = vector.broadcast %4 : vector<8x1xi32> to vector<8x50xi32>
    %15 = arith.cmpi eq, %7, %14 : vector<8x50xi32>
    %16 = arith.extui %15 : vector<8x50xi1> to vector<8x50xi32>
    %17 = arith.sitofp %16 : vector<8x50xi32> to vector<8x50xf32>
    %cst_11 = arith.constant dense<0.000000e+00> : vector<8x32xf32>
    %18 = tpu.matmul %17, %2, %cst_11 {dimension_numbers = #tpu.dot_dimension_numbers<[1], [0], [0], [1], [0, 0, 1, 1], [], []>} : vector<8x50xf32>, vector<50x32xf32>, vector<8x32xf32> -> vector<8x32xf32>
    %19 = vector.broadcast %6 : vector<64x1xi32> to vector<64x50xi32>
    %20 = arith.cmpi eq, %8, %19 : vector<64x50xi32>
    %21 = arith.extui %20 : vector<64x50xi1> to vector<64x50xi32>
    %22 = arith.sitofp %21 : vector<64x50xi32> to vector<64x50xf32>
    %cst_12 = arith.constant dense<0.000000e+00> : vector<64x32xf32>
    %23 = tpu.matmul %22, %1, %cst_12 {dimension_numbers = #tpu.dot_dimension_numbers<[1], [0], [0], [1], [0, 0, 1, 1], [], []>} : vector<64x50xf32>, vector<50x32xf32>, vector<64x32xf32> -> vector<64x32xf32>
    %24 = vector.broadcast %5 : vector<64x1xi32> to vector<64x50xi32>
    %25 = arith.cmpi eq, %8, %24 : vector<64x50xi32>
    %26 = arith.extui %25 : vector<64x50xi1> to vector<64x50xi32>
    %27 = arith.sitofp %26 : vector<64x50xi32> to vector<64x50xf32>
    %cst_13 = arith.constant dense<0.000000e+00> : vector<64x32xf32>
    %28 = tpu.matmul %27, %2, %cst_13 {dimension_numbers = #tpu.dot_dimension_numbers<[1], [0], [0], [1], [0, 0, 1, 1], [], []>} : vector<64x50xf32>, vector<50x32xf32>, vector<64x32xf32> -> vector<64x32xf32>
    %29 = tpu.iota {dimensions = array<i32: 0>} : vector<8x1xi32>
    %c32_i32 = arith.constant 32 : i32
    %30 = arith.subi %c32_i32, %0 : i32
    %31 = vector.broadcast %30 : i32 to vector<8x1xi32>
    %32 = arith.cmpi slt, %29, %31 : vector<8x1xi32>
    %33 = arith.extui %32 : vector<8x1xi1> to vector<8x1xi32>
    %34 = arith.sitofp %33 : vector<8x1xi32> to vector<8x1xf32>
    %35 = tpu.iota {dimensions = array<i32: 0>} : vector<64x1xi32>
    %c32_i32_14 = arith.constant 32 : i32
    %36 = arith.subi %c32_i32_14, %0 : i32
    %c8_i32_15 = arith.constant 8 : i32
    %37 = arith.muli %36, %c8_i32_15 : i32
    %38 = vector.broadcast %37 : i32 to vector<64x1xi32>
    %39 = arith.cmpi slt, %35, %38 : vector<64x1xi32>
    %40 = arith.extui %39 : vector<64x1xi1> to vector<64x1xi32>
    %41 = arith.sitofp %40 : vector<64x1xi32> to vector<64x1xf32>
    %42 = arith.mulf %13, %18 : vector<8x32xf32>
    %cst_16 = arith.constant dense<0.000000e+00> : vector<8xf32>
    %43 = vector.multi_reduction <add>, %42, %cst_16 [1] : vector<8x32xf32> to vector<8xf32>
    %44 = vector.shape_cast %43 : vector<8xf32> to vector<8x1xf32>
    %cst_17 = arith.constant -1.000000e+01 : f32
    %cst_18 = arith.constant 1.000000e+01 : f32
    %45 = vector.broadcast %cst_17 : f32 to vector<8x1xf32>
    %46 = arith.maximumf %45, %44 : vector<8x1xf32>
    %47 = vector.broadcast %cst_18 : f32 to vector<8x1xf32>
    %48 = arith.minimumf %47, %46 : vector<8x1xf32>
    %cst_19 = arith.constant 0.000000e+00 : f32
    %49 = vector.broadcast %cst_19 : f32 to vector<8x1xf32>
    %50 = arith.subf %49, %48 : vector<8x1xf32>
    %51 = math.exp %50 : vector<8x1xf32>
    %52 = math.log1p %51 : vector<8x1xf32>
    %53 = arith.mulf %52, %34 : vector<8x1xf32>
    %54 = arith.mulf %28, %23 : vector<64x32xf32>
    %cst_20 = arith.constant dense<0.000000e+00> : vector<64xf32>
    %55 = vector.multi_reduction <add>, %54, %cst_20 [1] : vector<64x32xf32> to vector<64xf32>
    %56 = vector.shape_cast %55 : vector<64xf32> to vector<64x1xf32>
    %cst_21 = arith.constant -1.000000e+01 : f32
    %cst_22 = arith.constant 1.000000e+01 : f32
    %57 = vector.broadcast %cst_21 : f32 to vector<64x1xf32>
    %58 = arith.maximumf %57, %56 : vector<64x1xf32>
    %59 = vector.broadcast %cst_22 : f32 to vector<64x1xf32>
    %60 = arith.minimumf %59, %58 : vector<64x1xf32>
    %61 = math.exp %60 : vector<64x1xf32>
    %62 = math.log1p %61 : vector<64x1xf32>
    %63 = arith.mulf %62, %41 : vector<64x1xf32>
    %64 = vector.shape_cast %53 : vector<8x1xf32> to vector<1x8x1xf32>
    %cst_23 = arith.constant dense<0.000000e+00> : vector<1xf32>
    %65 = vector.multi_reduction <add>, %64, %cst_23 [1, 2] : vector<1x8x1xf32> to vector<1xf32>
    %66 = vector.shape_cast %65 : vector<1xf32> to vector<1x1x1xf32>
    %67 = vector.extract %66[0, 0, 0] : f32 from vector<1x1x1xf32>
    %68 = vector.shape_cast %63 : vector<64x1xf32> to vector<1x64x1xf32>
    %cst_24 = arith.constant dense<0.000000e+00> : vector<1xf32>
    %69 = vector.multi_reduction <add>, %68, %cst_24 [1, 2] : vector<1x64x1xf32> to vector<1xf32>
    %70 = vector.shape_cast %69 : vector<1xf32> to vector<1x1x1xf32>
    %71 = vector.extract %70[0, 0, 0] : f32 from vector<1x1x1xf32>
    %72 = arith.addf %67, %71 : f32
    %73 = vector.broadcast %72 : f32 to vector<1x8x128xf32>
    %c0_25 = arith.constant 0 : index
    %c0_26 = arith.constant 0 : index
    %c0_27 = arith.constant 0 : index
    %74 = vector.load %arg7[%c0_25, %c0_26, %c0_27] : memref<1x8x128xf32, #tpu.memory_space<vmem>>, vector<1x8x128xf32>
    tpu.vector_store %arg7[%c0_25, %c0_26, %c0_27], %73 {strides = array<i32>} : memref<1x8x128xf32, #tpu.memory_space<vmem>>, vector<1x8x128xf32>,
    return
  }
  func.func @transform_0(%arg0: i32) -> (i32, i32) {
    %c0_i32 = arith.constant 0 : i32
    %c0_i32_0 = arith.constant 0 : i32
    return %arg0, %c0_i32 : i32, i32
  }
  func.func @transform_1(%arg0: i32) -> (i32, i32) {
    %c0_i32 = arith.constant 0 : i32
    %c0_i32_0 = arith.constant 0 : i32
    return %arg0, %c0_i32 : i32, i32
  }
  func.func @transform_2(%arg0: i32) -> (i32, i32) {
    %c0_i32 = arith.constant 0 : i32
    %c0_i32_0 = arith.constant 0 : i32
    return %arg0, %c0_i32 : i32, i32
  }
  func.func @transform_3(%arg0: i32) -> (i32, i32) {
    %c0_i32 = arith.constant 0 : i32
    %c0_i32_0 = arith.constant 0 : i32
    return %arg0, %c0_i32 : i32, i32
  }
  func.func @transform_4(%arg0: i32) -> (i32, i32) {
    %c0_i32 = arith.constant 0 : i32
    %c0_i32_0 = arith.constant 0 : i32
    %c0_i32_1 = arith.constant 0 : i32
    return %c0_i32, %c0_i32_0 : i32, i32
  }
  func.func @transform_5(%arg0: i32) -> (i32, i32) {
    %c0_i32 = arith.constant 0 : i32
    %c0_i32_0 = arith.constant 0 : i32
    %c0_i32_1 = arith.constant 0 : i32
    return %c0_i32, %c0_i32_0 : i32, i32
  }
  func.func @transform_6(%arg0: i32) -> (i32, i32, i32) {
    %c0_i32 = arith.constant 0 : i32
    %c0_i32_0 = arith.constant 0 : i32
    %c0_i32_1 = arith.constant 0 : i32
    return %arg0, %c0_i32, %c0_i32_0 : i32, i32, i32
  }
}

</mosaic_0001>

<bundles_post_ra>
// kernel: tpu_custom_call.1
= control target key start
LH: loop header
LB: loop body
LE: loop exit
PB: predicated region body
PF: predicated region fallthrough
CT: control target
= control target key end

     0   :  { %11 = vsyncpa [#allocation3], 0  ;;  %s2108_s0 = inlined_call_operand.vmem [shape: s32[32,1], index: 0, kind: input, shape index: {}]   ;;  %s2109_s1 = inlined_call_operand.vmem [shape: s32[32,1], index: 1, kind: input, shape index: {}]   ;;  %s2110_s2 = inlined_call_operand.vmem [shape: s32[256,1], index: 2, kind: input, shape index: {}]   ;;  %s2111_s3 = inlined_call_operand.vmem [shape: s32[256,1], index: 3, kind: input, shape index: {}]   ;;  %s2112_s4 = inlined_call_operand.vmem [shape: f32[50,32], index: 4, kind: input, shape index: {}]   ;;  %s2113_s5 = inlined_call_operand.vmem [shape: f32[50,32], index: 5, kind: input, shape index: {}]   ;;  %s2114_s6 = inlined_call_operand.hbm [shape: f32[4,8,128], index: 6, kind: output, shape index: {}]  }
   0x1   :  { %13 = vsyncpa [#allocation3 + $0x1], 0  ;;  %s1652_s21 = smov 0   ;;  %s1654_s22 = smov 0  }
   0x2   :  { %s1656_s23 = smov 0   ;;  %s1658_s24 = smov 0  }
   0x3 LB: > { %s1673_s25 = sadd.s32 4294967295, %s1610_s24   ;;  %s1214_s26 = sadd.s32 4294967294, %s1610_s24   ;;  %s1610_s24 = sphi %s1658_s24, %s2130_s24   ;;  %s1606_s23 = sphi %s1656_s23, %s2129_s23   ;;  %s1602_s22 = sphi %s1654_s22, %s2128_s22   ;;  %s1598_s21 = sphi %s1652_s21, %s2127_s21  }
   0x4   : > { %s1677_s27 = sadd.s32 1, %s1610_s24   ;;  %s172_s28 = sadd.s32 1, %s1606_s23 }
   0x5   : > { %s169_s29 = ssub.s32 %s1610_s24, %s1677_s27  ;;  %p182_p0 = scmp.ne.s32.totalorder %s1606_s23, %s1602_s22 }
   0x6   : > { %p170_p1 = scmp.eq.s32.totalorder %s169_s29, 0  ;;  %p183_p2 = scmp.eq.s32.totalorder %s1673_s25, 3 }
   0x7   : > { %p188_p3 = scmp.ne.s32.totalorder %s1602_s22, %s1598_s21  ;;  %p189_p4 = scmp.eq.s32.totalorder %s1214_s26, 3 }
   0x8   : > { %s1688_s30 = scalar_select %p170_p1, %s1606_s23, %s172_s28  }
   0x9   : > { %p1690_p5 = por %p183_p2, %p182_p0  ;;  %p1694_p6 = por %p189_p4, %p188_p3 }
   0xa   : > { %p1217_p7 = scmp.ge.s32.totalorder %s1610_s24, 1  ;;  %p245_p8 = scmp.lt.s32.totalorder %s1610_s24, 5 }
   0xc   : > { %p246_p9 = pnand %p1217_p7, %p245_p8 }
   0xd   : > { %p288_p10 = scmp.lt.s32.totalorder (!%p246_p9), %s1673_s25, 3  ;;  %s1702_s9 = sshll.u32 (!%p246_p9), %s1673_s25, 3  ;;  %v309_v0 = vld [vmem:[%s2112_s4] sm:$0xff] (!%p246_p9)  ;;  %v310_v1 = vld [vmem:[%s2112_s4 + $0x8] sm:$0xff] (!%p246_p9)  ;;  %v1612_v2 = vmov (!%p246_p9), 0   ;;  %v311_v4 = vld [vmem:[%s2112_s4 + $0x10] sm:$0xff] (!%p246_p9)  ;;  %v341_v41 = vlaneseq (!%p246_p9) }
   0xe   : > { %249 = sbr.rel (%p246_p9) target bundleno = 808 (0x328), region = 44  ;;  %1510 = vset.pattern.permute.xlu0 (!%p246_p9), %v1612_v2  ;;  %1511 = vset.pattern.permute.xlu1 (!%p246_p9), %v1612_v2  ;;  %p297_p11 = scmp.lt.s32.totalorder (!%p246_p9), %s1702_s9, 31  ;;  %v1711_v3 = vpack.c.bf16 (!%p246_p9), %v310_v1, %v309_v0  ;;  %v312_v5 = vld [vmem:[%s2112_s4 + $0x18] sm:$0xff] (!%p246_p9)  ;;  %v316_v6 = vld [vmem:[%s2113_s5] sm:$0xff] (!%p246_p9)  ;;  %v1613_v7 = vmov (!%p246_p9), 0.0|0.0   ;;  %v317_v8 = vld [vmem:[%s2113_s5 + $0x8] sm:$0xff] (!%p246_p9) }
   0xf   : > { %1421 = vmatprep.subr.bf16.mxu0 (!%p246_p9), %v1613_v7  ;;  %1430 = vmatprep.subr.bf16.mxu1 (!%p246_p9), %v1613_v7  ;;  %v1728_v9 = vpack.c.bf16 (!%p246_p9), %v312_v5, %v311_v4  ;;  %v1730_v10 = vpack.c.bf16 (!%p246_p9), %v317_v8, %v316_v6  ;;  %v318_v11 = vld [vmem:[%s2113_s5 + $0x10] sm:$0xff] (!%p246_p9)  ;;  %v319_v12 = vld [vmem:[%s2113_s5 + $0x18] sm:$0xff] (!%p246_p9)  ;;  %v313_v13 = vld [vmem:[%s2112_s4 + $0x20] sm:$0xff] (!%p246_p9)  ;;  %vm1614_vm0 = vmmov (!%p246_p9), 0   ;;  %v1615_v24 = vmov (!%p246_p9), 0.0   ;;  %s1286_s17 = sshll.u32 (!%p246_p9), %s1673_s25, 7 }
  0x10   : > { %1423 = vmatpush3.bf16.msra.mxu0 (!%p246_p9), %v1711_v3  ;;  %v314_v14 = vld [vmem:[%s2112_s4 + $0x28] sm:$0xff] (!%p246_p9)  ;;  %v1748_v15 = vpack.c.bf16 (!%p246_p9), %v319_v12, %v318_v11  ;;  %v320_v17 = vld [vmem:[%s2113_s5 + $0x20] sm:$0xff] (!%p246_p9)  ;;  %1349 = vmatprep.mubr.msk.f32.mxu0 (!%p246_p9), %vm1614_vm0, %v1615_v24  ;;  %v1785_v26 = vld [vmem:[%s2112_s4 + $0x30] sm:$0x3] (!%p246_p9)  ;;  %vm353_vm1 = vcmask (!%p246_p9), 1041408   ;;  %v1814_v42 = vand.u32 (!%p246_p9), 127, %v341_v41 }
  0x11   : > { %1424 = vmatprep.subr.bf16.mxu0 (!%p246_p9), %v1613_v7  ;;  %1432 = vmatpush3.bf16.msra.mxu1 (!%p246_p9), %v1730_v10  ;;  %v321_v18 = vld [vmem:[%s2113_s5 + $0x28] sm:$0xff] (!%p246_p9)  ;;  %v1771_v20 = vpack.c.bf16 (!%p246_p9), %v314_v14, %v313_v13  ;;  %v1793_v28 = vld [vmem:[%s2113_s5 + $0x30] sm:$0x3] (!%p246_p9)  ;;  %vm349_vm2 = vcmask (!%p246_p9), 408576  }
  0x12   : > { %1433 = vmatprep.subr.bf16.mxu1 (!%p246_p9), %v1613_v7  ;;  %v1775_v23 = vpack.c.bf16 (!%p246_p9), %v321_v18, %v320_v17  ;;  %1366 = vmatprep.mubr.msk.f32.mxu1 (!%p246_p9), %vm1614_vm0, %v1615_v24 }
  0x14   : > { %1426 = vmatpush3.bf16.msra.mxu0 (!%p246_p9), %v1728_v9 }
  0x15   : > { %s289_s20 = scalar_select %p288_p10, %s1673_s25, 3  ;;  %1427 = vmatprep.subr.bf16.mxu0 %v1613_v7  ;;  %1435 = vmatpush3.bf16.msra.mxu1 %v1748_v15 }
  0x16   : > { %s298_s29 = scalar_select %p297_p11, %s1702_s9, 31  ;;  %1436 = vmatprep.subr.bf16.mxu1 %v1613_v7 }
  0x17   : > { %s1219_s14 = sshll.u32 %s289_s20, 3  ;;  %s1616_s25 = smov [#allocation2]  }
  0x18   : > { %s291_s28 = scalar_lea.vmem %s2108_s0, %s1219_s14  ;;  %s1222_s10 = sshll.u32 %s298_s29, 3  ;;  %1429 = vmatpush3.bf16.msra.mxu0 %v1771_v20 }
  0x19   : > { %v323_v16 = vld [vmem:[%s291_s28] sm:$0xff]  ;;  %s1753_s12 = scalar_lea.vmem %s2111_s3, %s1222_s10  ;;  %s295_s16 = scalar_lea.vmem %s2109_s1, %s1219_s14  ;;  %1347 = vmatprep.subr.mxu0 %v1615_v24  ;;  %1438 = vmatpush3.bf16.msra.mxu1 %v1775_v23 }
  0x1a   : > { %344 = vperm.xlu0 %1510, %v323_v16   ;;  %v333_v19 = vld [vmem:[%s1753_s12] sm:$0xff]  ;;  %s1768_s20 = scalar_lea.vmem %s2110_s2, %s1222_s10  ;;  %v334_v25 = vld [vmem:[%s1753_s12 + $0x8] sm:$0xff]  ;;  %1364 = vmatprep.subr.mxu1 %v1615_v24  ;;  %v335_v29 = vld [vmem:[%s1753_s12 + $0x10] sm:$0xff]  ;;  %s2066_s10 = scalar_lea.hbm %s2114_s6, %s1286_s17 }
  0x1b   : > { %510 = vperm.xlu1 %1511, %v333_v19   ;;  %v324_v21 = vld [vmem:[%s295_s16] sm:$0xff]  ;;  %v326_v27 = vld [vmem:[%s1768_s20 + $0x8] sm:$0xff]  ;;  %v327_v30 = vld [vmem:[%s1768_s20 + $0x10] sm:$0xff] }
  0x1c   : > { %v325_v22 = vld [vmem:[%s1768_s20] sm:$0xff]  ;;  %1348 = vmatpush3.msk.msra.mxu0 %vm353_vm1, %v1785_v26  ;;  %v336_v31 = vld [vmem:[%s1753_s12 + $0x18] sm:$0xff]  ;;  %v338_v35 = vld [vmem:[%s1753_s12 + $0x28] sm:$0xff] }
  0x1d   : > { %1440 = vmatprep.subr.bf16.mxu0 %v1711_v3  ;;  %1365 = vmatpush3.msk.msra.mxu1 %vm353_vm1, %v1793_v28  ;;  %v328_v32 = vld [vmem:[%s1768_s20 + $0x18] sm:$0xff]  ;;  %v337_v33 = vld [vmem:[%s1753_s12 + $0x20] sm:$0xff]  ;;  %v330_v36 = vld [vmem:[%s1768_s20 + $0x28] sm:$0xff] }
  0x1e   : > { %428 = vperm.xlu0 %1510, %v324_v21   ;;  %1452 = vmatprep.subr.bf16.mxu1 %v1730_v10  ;;  %v329_v34 = vld [vmem:[%s1768_s20 + $0x20] sm:$0xff]  ;;  %v339_v37 = vld [vmem:[%s1753_s12 + $0x30] sm:$0xff]  ;;  %v340_v39 = vld [vmem:[%s1753_s12 + $0x38] sm:$0xff]  ;;  %s865_s12 = ssub.s32 32, %s1702_s9  ;;  %s285_s9 = sand.u32 1, %s1602_s22  }
  0x1f   : > { %687 = vperm.xlu1 %1511, %v325_v22   ;;  %v331_v38 = vld [vmem:[%s1768_s20 + $0x30] sm:$0xff]  ;;  %v332_v40 = vld [vmem:[%s1768_s20 + $0x38] sm:$0xff]  ;;  %s1267_s15 = sshll.u32 %s865_s12, 3  ;;  %s1218_s16 = sshll.u32 %s285_s9, 3 }
  0x20   : > { %s287_s29 = scalar_lea.vmem [#allocation2], %s1218_s16  ;;  %s1106_s11 = scalar_lea.sflag [#allocation3], %s285_s9 }
  0x21   : > { %s1119_s19 = sshll.u32 %s287_s29, 4  ;;  %s2068_s19 = int_to_ptr.vmem [resolvable:$true] %s1119_s19 }
  0x22   : > { %513 = vperm.xlu0 %1510, %v334_v25   ;;  %s1548_s13 = scalar_lea.vmem %s2068_s19, 128 }
  0x23   : > { %690 = vperm.xlu1 %1511, %v326_v27   ;;  %p1549_p12 = scmp.ne.s32.totalorder %s2068_s19, %s1548_s13 }
  0x25   : > { %p1550_p13 = pnand %p1549_p12, %p1690_p5 }
  0x26   : > { %516 = vperm.xlu0 %1510, %v335_v29  }
  0x27   : > { %693 = vperm.xlu1 %1511, %v327_v30   ;;  %p1551_p0 = pneg %p1550_p13 }
  0x2a   : > { %519 = vperm.xlu0 %1510, %v336_v31  }
  0x2b   : > { %696 = vperm.xlu1 %1511, %v328_v32  }
  0x2e   : > { %522 = vperm.xlu0 %1510, %v337_v33  }
  0x2f   : > { %699 = vperm.xlu1 %1511, %v329_v34  }
  0x32   : > { %525 = vperm.xlu0 %1510, %v338_v35  }
  0x33   : > { %702 = vperm.xlu1 %1511, %v330_v36  }
  0x36   : > { %528 = vperm.xlu0 %1510, %v339_v37  }
  0x37   : > { %705 = vperm.xlu1 %1511, %v331_v38  }
  0x3a   : > { %531 = vperm.xlu0 %1510, %v340_v39  }
  0x3b   : > { %708 = vperm.xlu1 %1511, %v332_v40  }
  0x99   : > { %v345_v43 = vpop.permute.xlu0 %344 }
  0x9a   : > { %vm346_vm3 = vcmp.eq.s32.totalorder %v1814_v42, %v345_v43  ;;  %v511_v44 = vpop.permute.xlu1 %510 }
  0x9b   : > { %v1226_v45 = vsel %vm346_vm3, 1.0, %v1615_v24  ;;  %vm533_vm4 = vcmp.eq.s32.totalorder %v1814_v42, %v511_v44 }
  0x9c   : > { %v1232_v46 = vsel %vm533_vm4, 1.0, %v1615_v24  ;;  %1350 = vmatmul.mubr.msk.f32.vlgmr.msra.gmra.mrb[0].mxu0 %vm349_vm2, %v1226_v45 }
  0x9d   : > { %1442 = vmatpush3.bf16.msra.mxu0 %v1711_v3  ;;  %1383 = vmatprep.mubr.msk.f32.mxu0 %vm349_vm2, %v1232_v46  ;;  %v429_v47 = vpop.permute.xlu0 %428 }
  0x9e   : > { %vm430_vm5 = vcmp.eq.s32.totalorder %v1814_v42, %v429_v47  ;;  %v688_v48 = vpop.permute.xlu1 %687  ;;  %1444 = vmatprep.subr.bf16.mxu0 %v1728_v9 }
  0x9f   : > { %v1229_v49 = vsel %vm430_vm5, 1.0, %v1615_v24  ;;  %vm710_vm6 = vcmp.eq.s32.totalorder %v1814_v42, %v688_v48 }
  0xa0   : > { %v1249_v50 = vsel %vm710_vm6, 1.0, %v1615_v24  ;;  %1367 = vmatmul.mubr.msk.f32.vlgmr.msra.gmra.mrb[0].mxu1 %vm349_vm2, %v1229_v49  ;;  %vm904_vm6 = vcmask 261120  }
  0xa1   : > { %1446 = vmatpush3.bf16.msra.mxu0 %v1728_v9  ;;  %1454 = vmatpush3.bf16.msra.mxu1 %v1730_v10  ;;  %v514_v51 = vpop.permute.xlu0 %513 }
  0xa2   : > { %1409 = vmatprep.mubr.msk.f32.mxu1 %vm349_vm2, %v1249_v50  ;;  %v691_v52 = vpop.permute.xlu1 %690  ;;  %1448 = vmatprep.subr.bf16.mxu0 %v1771_v20  ;;  %vm534_vm7 = vcmp.eq.s32.totalorder %v1814_v42, %v514_v51 }
  0xa3   : > { %1456 = vmatprep.subr.bf16.mxu1 %v1748_v15  ;;  %v1233_v55 = vsel %vm534_vm7, 1.0, %v1615_v24  ;;  %vm711_vm9 = vcmp.eq.s32.totalorder %v1814_v42, %v691_v52 }
  0xa4   : > { %v1250_v60 = vsel %vm711_vm9, 1.0, %v1615_v24 }
  0xa5   : > { %1450 = vmatpush3.bf16.msra.mxu0 %v1771_v20  ;;  %1458 = vmatpush3.bf16.msra.mxu1 %v1748_v15  ;;  %v517_v53 = vpop.permute.xlu0 %516 }
  0xa6   : > { %v694_v54 = vpop.permute.xlu1 %693  ;;  %1381 = vmatprep.subr.msk.mxu0 %vm353_vm1, %v1785_v26  ;;  %1460 = vmatprep.subr.bf16.mxu1 %v1775_v23  ;;  %vm535_vm8 = vcmp.eq.s32.totalorder %v1814_v42, %v517_v53 }
  0xa7   : > { %v1234_v57 = vsel %vm535_vm8, 1.0, %v1615_v24  ;;  %vm712_vm11 = vcmp.eq.s32.totalorder %v1814_v42, %v694_v54 }
  0xa8   : > { %v1251_v62 = vsel %vm712_vm11, 1.0, %v1615_v24 }
  0xa9   : > { %1382 = vmatpush3.msk.msra.mxu0 %vm353_vm1, %v1785_v26  ;;  %1462 = vmatpush3.bf16.msra.mxu1 %v1775_v23  ;;  %v520_v56 = vpop.permute.xlu0 %519 }
  0xaa   : > { %1384 = vmatmul.mubr.msk.f32.vlgmr.msra.gmra.mrb[2].mxu0 %vm349_vm2, %v1233_v55  ;;  %vm536_vm10 = vcmp.eq.s32.totalorder %v1814_v42, %v520_v56  ;;  %v697_v58 = vpop.permute.xlu1 %696  ;;  %1407 = vmatprep.subr.msk.mxu1 %vm353_vm1, %v1793_v28 }
  0xab   : > { %v1235_v59 = vsel %vm536_vm10, 1.0, %v1615_v24  ;;  %1386 = vmatprep.mubr.msk.f32.mxu0 %vm349_vm2, %v1234_v57  ;;  %vm713_vm12 = vcmp.eq.s32.totalorder %v1814_v42, %v697_v58 }
  0xac   : > { %v1252_v2 = vsel %vm713_vm12, 1.0, %v1615_v24  ;;  %vm1067_vm12 = vcmask 7168  }
  0xad   : > { %1408 = vmatpush3.msk.msra.mxu1 %vm353_vm1, %v1793_v28  ;;  %v523_v61 = vpop.permute.xlu0 %522 }
  0xae   : > { %1387 = vmatmul.mubr.msk.f32.gmra.mrb[4].mxu0 %vm349_vm2, %v1235_v59  ;;  %1410 = vmatmul.mubr.msk.f32.vlgmr.msra.gmra.mrb[2].mxu1 %vm349_vm2, %v1250_v60  ;;  %vm537_vm13 = vcmp.eq.s32.totalorder %v1814_v42, %v523_v61  ;;  %v700_v63 = vpop.permute.xlu1 %699 }
  0xaf   : > { %v1236_v0 = vsel %vm537_vm13, 1.0, %v1615_v24  ;;  %vm714_vm14 = vcmp.eq.s32.totalorder %v1814_v42, %v700_v63  ;;  %1412 = vmatprep.mubr.msk.f32.mxu1 %vm349_vm2, %v1251_v62 }
  0xb0   : > { %v1253_v1 = vsel %vm714_vm14, 1.0, %v1615_v24  ;;  %1389 = vmatprep.mubr.msk.f32.mxu0 %vm349_vm2, %v1236_v0 }
  0xb1   : > { %v526_v3 = vpop.permute.xlu0 %525 }
  0xb2   : > { %1413 = vmatmul.mubr.msk.f32.gmra.mrb[4].mxu1 %vm349_vm2, %v1252_v2  ;;  %vm538_vm15 = vcmp.eq.s32.totalorder %v1814_v42, %v526_v3  ;;  %v703_v4 = vpop.permute.xlu1 %702 }
  0xb3   : > { %v1237_v5 = vsel %vm538_vm15, 1.0, %v1615_v24  ;;  %vm715_vm0 = vcmp.eq.s32.totalorder %v1814_v42, %v703_v4  ;;  %1415 = vmatprep.mubr.msk.f32.mxu1 %vm349_vm2, %v1253_v1  ;;  %v1899_v4 = vshrl.u32 %v341_v41, 7 }
  0xb4   : > { %v1254_v6 = vsel %vm715_vm0, 1.0, %v1615_v24  ;;  %1390 = vmatmul.mubr.msk.f32.gmra.mrb[6].mxu0 %vm349_vm2, %v1237_v5 }
  0xb5   : > { %v529_v7 = vpop.permute.xlu0 %528 }
  0xb6   : > { %1416 = vmatmul.mubr.msk.f32.gmra.mrb[6].mxu1 %vm349_vm2, %v1254_v6  ;;  %vm539_vm1 = vcmp.eq.s32.totalorder %v1814_v42, %v529_v7  ;;  %v706_v8 = vpop.permute.xlu1 %705 }
  0xb7   : > { %v1238_v9 = vsel %vm539_vm1, 1.0, %v1615_v24  ;;  %vm716_vm3 = vcmp.eq.s32.totalorder %v1814_v42, %v706_v8 }
  0xb8   : > { %v1255_v10 = vsel %vm716_vm3, 1.0, %v1615_v24  ;;  %1392 = vmatprep.mubr.msk.f32.mxu0 %vm349_vm2, %v1238_v9 }
  0xb9   : > { %1418 = vmatprep.mubr.msk.f32.mxu1 %vm349_vm2, %v1255_v10  ;;  %v532_v11 = vpop.permute.xlu0 %531  ;;  %v870_v10 = vadd.s32 8, %v1899_v4 }
  0xba   : > { %vm540_vm4 = vcmp.eq.s32.totalorder %v1814_v42, %v532_v11  ;;  %v709_v12 = vpop.permute.xlu1 %708 }
  0xbb   : > { %v1239_v13 = vsel %vm540_vm4, 1.0, %v1615_v24  ;;  %vm717_vm5 = vcmp.eq.s32.totalorder %v1814_v42, %v709_v12 }
  0xbc   : > { %v1256_v14 = vsel %vm717_vm5, 1.0, %v1615_v24  ;;  %1393 = vmatmul.mubr.msk.f32.gmra.mrb[8].mxu0 %vm349_vm2, %v1239_v13 }
  0xbd   : > { %1419 = vmatmul.mubr.msk.f32.gmra.mrb[8].mxu1 %vm349_vm2, %v1256_v14  ;;  %v1908_v14 = vstv %s1267_s15 }
  0xbe   : > { %vm879_vm2 = vcmp.lt.s32.totalorder %v1899_v4, %v1908_v14  ;;  %vm880_vm7 = vcmp.lt.s32.totalorder %v870_v10, %v1908_v14 }
 0x16f   : > { %v423_v15 = vpop.f32.mrb[0].mxu0 }
 0x170   : > { %v1351_v16 = vpop.f32.mrb[1].mxu0 }
 0x173   : > { %v505_v17 = vpop.f32.mrb[0].mxu1 }
 0x174   : > { %v903_v18 = vmul.f32 %v505_v17, %v423_v15  ;;  %v1368_v19 = vpop.f32.mrb[1].mxu1 }
 0x175   : > { %v871_v19 = vadd.s32 16, %v1899_v4 }
 0x176   : > { %v905_v53 = vsel %vm904_vm6, %v903_v18, 0.0 }
 0x177   : > { %vm881_vm8 = vcmp.lt.s32.totalorder %v871_v19, %v1908_v14 }
 0x17d   : > { %v1385_v20 = vpop.f32.mrb[2].mxu0 }
 0x17e   : > { %v647_v21 = vpop.f32.mrb[3].mxu0 }
 0x181   : > { %v1388_v22 = vpop.f32.mrb[4].mxu0  ;;  %v1411_v23 = vpop.f32.mrb[2].mxu1 }
 0x182   : > { %v924_v25 = vmul.f32 %v1411_v23, %v1385_v20  ;;  %v657_v26 = vpop.f32.mrb[5].mxu0  ;;  %v824_v27 = vpop.f32.mrb[3].mxu1 }
 0x183   : > { %v923_v28 = vmul.f32 %v824_v27, %v647_v21 }
 0x184   : > { %v934_v29 = vsel %vm904_vm6, %v924_v25, 0.0  ;;  %v872_v25 = vadd.s32 24, %v1899_v4 }
 0x185   : > { %v1414_v30 = vpop.f32.mrb[4].mxu1  ;;  %935 = vadd.xlane.f32.xlu1 %v934_v29  ;;  %v931_v31 = vsel %vm904_vm6, %v923_v28, 0.0  ;;  %v874_v28 = vadd.s32 40, %v1899_v4 }
 0x186   : > { %v926_v32 = vmul.f32 %v1414_v30, %v1388_v22  ;;  %v834_v33 = vpop.f32.mrb[5].mxu1  ;;  %932 = vadd.xlane.f32.xlu0 %v931_v31  ;;  %v1924_v31 = vstv %s865_s12  ;;  %vm882_vm9 = vcmp.lt.s32.totalorder %v872_v25, %v1908_v14  ;;  %s1552_s12 = sshll.u32 %s1616_s25, 4  ;;  %s1553_s12 = int_to_ptr.vmem [resolvable:$false] %s1552_s12 }
 0x187   : > { %v925_v34 = vmul.f32 %v834_v33, %v657_v26  ;;  %v1391_v35 = vpop.f32.mrb[6].mxu0  ;;  %v873_v26 = vadd.s32 32, %v1899_v4  ;;  %vm884_vm11 = vcmp.lt.s32.totalorder %v874_v28, %v1908_v14  ;;  %vm867_vm1 = vcmp.lt.s32.totalorder %v1899_v4, %v1924_v31  ;;  %s1554_s15 = scalar_lea.vmem %s1553_s12, 256  ;;  %p1555_p1 = scmp.lt.s32.totalorder %s2068_s19, %s1553_s12 }
 0x188   : > { %v667_v36 = vpop.f32.mrb[7].mxu0  ;;  %v940_v43 = vsel %vm904_vm6, %v926_v32, 0.0  ;;  %p1556_p2 = scmp.lt.s32.totalorder %s1554_s15, %s1548_s13 }
 0x189   : > { %v1417_v37 = vpop.f32.mrb[6].mxu1  ;;  %v937_v38 = vsel %vm904_vm6, %v925_v34, 0.0  ;;  %v1931_v34 = vsel %vm880_vm7, 1.0, %v1615_v24  ;;  %vm883_vm10 = vcmp.lt.s32.totalorder %v873_v26, %v1908_v14 }
 0x18a   : > { %v928_v39 = vmul.f32 %v1417_v37, %v1391_v35  ;;  %v844_v40 = vpop.f32.mrb[7].mxu1  ;;  %938 = vadd.xlane.f32.xlu0 %v937_v38  ;;  %v1268_v37 = vsel %vm879_vm2, 1.0, %v1615_v24  ;;  %p1557_p3 = por %p1556_p2, %p1555_p1 }
 0x18b   : > { %v927_v42 = vmul.f32 %v844_v40, %v667_v36 }
 0x18c   : > { %v946_v50 = vsel %vm904_vm6, %v928_v39, 0.0  ;;  %v1946_v39 = vsel %vm881_vm8, 1.0, %v1615_v24  ;;  %p1558_p4 = pnand %p1557_p3, %p1551_p0 }
 0x18d   : > { %v943_v44 = vsel %vm904_vm6, %v927_v42, 0.0 }
 0x18e   : > { %941 = vadd.xlane.f32.xlu0 %v940_v43  ;;  %944 = vadd.xlane.f32.xlu1 %v943_v44 }
 0x18f   : > { %v1394_v45 = vpop.f32.mrb[8].mxu0 }
 0x190   : > { %v677_v46 = vpop.f32.mrb[9].mxu0  ;;  %v1420_v47 = vpop.f32.mrb[8].mxu1 }
 0x191   : > { %v930_v48 = vmul.f32 %v1420_v47, %v1394_v45  ;;  %v854_v49 = vpop.f32.mrb[9].mxu1  ;;  %v1956_v47 = vsel %vm883_vm10, 1.0, %v1615_v24 }
 0x192   : > { %v929_v51 = vmul.f32 %v854_v49, %v677_v46  ;;  %947 = vadd.xlane.f32.xlu0 %v946_v50  ;;  %v1953_v46 = vsel %vm882_vm9, 1.0, %v1615_v24  ;;  %v1961_v50 = vadd.s32 48, %v1899_v4 }
 0x193   : > { %v952_v54 = vsel %vm904_vm6, %v930_v48, 0.0 }
 0x194   : > { %v949_v52 = vsel %vm904_vm6, %v929_v51, 0.0  ;;  %v1964_v51 = vsel %vm884_vm11, 1.0, %v1615_v24  ;;  %vm885_vm14 = vcmp.lt.s32.totalorder %v1961_v50, %v1908_v14 }
 0x195   : > { %950 = vadd.xlane.f32.xlu1 %v949_v52 }
 0x196   : > { %906 = vadd.xlane.f32.xlu0 %v905_v53 }
 0x199   : > { %953 = vadd.xlane.f32.xlu1 %v952_v54  ;;  %v1968_v54 = vadd.s32 56, %v1899_v4 }
 0x19b   : > { %vm886_vm6 = vcmp.lt.s32.totalorder %v1968_v54, %v1908_v14 }
 0x19c   : > { %v1275_v54 = vsel %vm886_vm6, 1.0, %v1615_v24 }
 0x212   : > { %v936_v55 = vpop.xlane.xlu1 %935 }
 0x213   : > { %v1278_v56 = vclamps-f32 %v936_v55, 10.0  ;;  %v933_v57 = vpop.xlane.xlu0 %932 }
 0x214   : > { %v1277_v58 = vclamps-f32 %v933_v57, 10.0 }
 0x215   : > { %v973_v59 = vmul.f32 1.442695, %v1278_v56 }
 0x216   : > { %v971_v60 = vmul.f32 1.442695, %v1277_v58 }
 0x217   : > { %1512 = vpow2.f32 %v973_v59  ;;  %v939_v61 = vpop.xlane.xlu0 %938 }
 0x218   : > { %1514 = vpow2.f32 %v971_v60  ;;  %v1279_v62 = vclamps-f32 %v939_v61, 10.0  ;;  %v1274_v61 = vsel %vm885_vm14, 1.0, %v1615_v24 }
 0x21a   : > { %v975_v63 = vmul.f32 1.442695, %v1279_v62 }
 0x21b   : > { %v945_v0 = vpop.xlane.xlu1 %944  ;;  %v942_v1 = vpop.xlane.xlu0 %941 }
 0x21c   : > { %1516 = vpow2.f32 %v975_v63  ;;  %v1281_v2 = vclamps-f32 %v945_v0, 10.0  ;;  %v1280_v3 = vclamps-f32 %v942_v1, 10.0 }
 0x21e   : > { %v979_v5 = vmul.f32 1.442695, %v1281_v2  ;;  %v977_v6 = vmul.f32 1.442695, %v1280_v3 }
 0x21f   : > { %v948_v7 = vpop.xlane.xlu0 %947 }
 0x220   : > { %1518 = vpow2.f32 %v979_v5  ;;  %v1282_v8 = vclamps-f32 %v948_v7, 10.0 }
 0x221   : > { %v1903_v9 = vpop.eup %1512  ;;  %1520 = vpow2.f32 %v977_v6 }
 0x222   : > { %v1906_v11 = vpop.eup %1514  ;;  %v981_v12 = vmul.f32 1.442695, %v1282_v8  ;;  %v951_v13 = vpop.xlane.xlu1 %950  ;;  %v996_v41 = vadd.f32 1.0, %v1903_v9  ;;  %v999_v35 = vmul.f32 -0.5, %v1903_v9  ;;  %v1002_v52 = vand.u32 2147483647, %v1903_v9 }
 0x223   : > { %v1283_v15 = vclamps-f32 %v951_v13, 10.0  ;;  %v907_v16 = vpop.xlane.xlu0 %906  ;;  %v987_v17 = vadd.f32 1.0, %v1906_v11  ;;  %v990_v32 = vmul.f32 -0.5, %v1906_v11  ;;  %v993_v43 = vand.u32 2147483647, %v1906_v11 }
 0x224   : > { %1522 = vpow2.f32 %v981_v12  ;;  %v1276_v18 = vclamps-f32 %v907_v16, 10.0  ;;  %v1000_v48 = vadd.f32 1.0, %v999_v35  ;;  %vm1986_vm15 = vcmp.lt.f32.partialorder %v1002_v52, 0.0004427343 }
 0x225   : > { %v983_v20 = vmul.f32 1.442695, %v1283_v15  ;;  %1524 = vlog2.f32 %v987_v17  ;;  %v991_v42 = vadd.f32 1.0, %v990_v32  ;;  %vm1974_vm13 = vcmp.lt.f32.partialorder %v993_v43, 0.0004427343 }
 0x226   : > { %v1916_v21 = vpop.eup %1516  ;;  %v910_v22 = vsub.f32 0.0, %v1276_v18  ;;  %v954_v23 = vpop.xlane.xlu1 %953  ;;  %1526 = vlog2.f32 %v996_v41  ;;  %v1001_v1 = vmul.f32 %v1903_v9, %v1000_v48 }
 0x227   : > { %1528 = vpow2.f32 %v983_v20  ;;  %v1284_v27 = vclamps-f32 %v954_v23, 10.0  ;;  %v1005_v29 = vadd.f32 1.0, %v1916_v21  ;;  %v1008_v44 = vmul.f32 -0.5, %v1916_v21 }
 0x228   : > { %v911_v30 = vmul.f32 1.442695, %v910_v22  ;;  %v1011_v55 = vand.u32 2147483647, %v1916_v21  ;;  %v992_v60 = vmul.f32 %v1906_v11, %v991_v42 }
 0x229   : > { %v985_v33 = vmul.f32 1.442695, %v1284_v27  ;;  %1530 = vlog2.f32 %v1005_v29  ;;  %v1009_v62 = vadd.f32 1.0, %v1008_v44 }
 0x22a   : > { %v1934_v36 = vpop.eup %1518  ;;  %1532 = vpow2.f32 %v911_v30  ;;  %vm1994_vm0 = vcmp.lt.f32.partialorder %v1011_v55, 0.0004427343 }
 0x22b   : > { %v1942_v38 = vpop.eup %1520  ;;  %1534 = vpow2.f32 %v985_v33  ;;  %v1023_v40 = vadd.f32 1.0, %v1934_v36  ;;  %v1026_v56 = vmul.f32 -0.5, %v1934_v36  ;;  %v1029_v6 = vand.u32 2147483647, %v1934_v36 }
 0x22c   : > { %v1014_v45 = vadd.f32 1.0, %v1942_v38  ;;  %v1017_v2 = vmul.f32 -0.5, %v1942_v38  ;;  %v1020_v11 = vand.u32 2147483647, %v1942_v38  ;;  %v1010_v15 = vmul.f32 %v1916_v21, %v1009_v62 }
 0x22d   : > { %1536 = vlog2.f32 %v1023_v40  ;;  %v1027_v12 = vadd.f32 1.0, %v1026_v56  ;;  %vm2011_vm3 = vcmp.lt.f32.partialorder %v1029_v6, 0.0004427343 }
 0x22e   : > { %v1958_v49 = vpop.eup %1522  ;;  %1538 = vlog2.f32 %v1014_v45  ;;  %v1018_v19 = vadd.f32 1.0, %v1017_v2  ;;  %vm2017_vm4 = vcmp.lt.f32.partialorder %v1020_v11, 0.0004427343 }
 0x22f   : > { %v1525_v53 = vpop.eup %1524  ;;  %v1032_v57 = vadd.f32 1.0, %v1958_v49  ;;  %v1035_v16 = vmul.f32 -0.5, %v1958_v49  ;;  %v1028_v29 = vmul.f32 %v1934_v36, %v1027_v12  ;;  %v1038_v30 = vand.u32 2147483647, %v1958_v49 }
 0x230   : > { %v1527_v58 = vpop.eup %1526  ;;  %v989_v59 = vmul.f32 0.6931472, %v1525_v53  ;;  %v1019_v42 = vmul.f32 %v1942_v38, %v1018_v19 }
 0x231   : > { %v1978_v63 = vpop.eup %1528  ;;  %v998_v0 = vmul.f32 0.6931472, %v1527_v58  ;;  %1540 = vlog2.f32 %v1032_v57  ;;  %v1036_v35 = vadd.f32 1.0, %v1035_v16  ;;  %vm1039_vm5 = vcmp.lt.f32.partialorder %v1038_v30, 0.0004427343 }
 0x232   : > { %v995_v3 = vsel %vm1974_vm13, %v992_v60, %v989_v59  ;;  %v1041_v7 = vadd.f32 1.0, %v1978_v63  ;;  %v1044_v20 = vmul.f32 -0.5, %v1978_v63 }
 0x233   : > { %v1531_v8 = vpop.eup %1530  ;;  %v1004_v9 = vsel %vm1986_vm15, %v1001_v1, %v998_v0  ;;  %v1059_v22 = vmul.f32 %v1268_v37, %v995_v3  ;;  %v1037_v57 = vmul.f32 %v1958_v49, %v1036_v35 }
 0x234   : > { %v1999_v13 = vpop.eup %1532  ;;  %v1007_v41 = vmul.f32 0.6931472, %v1531_v8  ;;  %1542 = vlog2.f32 %v1041_v7  ;;  %v1060_v26 = vmul.f32 %v1931_v34, %v1004_v9  ;;  %v1045_v34 = vadd.f32 1.0, %v1044_v20 }
 0x235   : > { %v2003_v17 = vpop.eup %1534  ;;  %v913_v18 = vadd.f32 1.0, %v1999_v13  ;;  %v1078_v43 = vsel %vm1067_vm12, %v1059_v22, 0.0  ;;  %v916_v44 = vmul.f32 -0.5, %v1999_v13  ;;  %v919_v60 = vand.u32 2147483647, %v1999_v13 }
 0x236   : > { %v1013_v23 = vsel %vm1994_vm0, %v1010_v15, %v1007_v41  ;;  %v1050_v21 = vadd.f32 1.0, %v2003_v17  ;;  %v1079_v36 = vsel %vm1067_vm12, %v1060_v26, 0.0  ;;  %v1053_v38 = vmul.f32 -0.5, %v2003_v17 }
 0x237   : > { %v1537_v27 = vpop.eup %1536  ;;  %1544 = vlog2.f32 %v913_v18  ;;  %v1061_v37 = vmul.f32 %v1946_v39, %v1013_v23  ;;  %v1047_v39 = vand.u32 2147483647, %v1978_v63  ;;  %v1080_v55 = vadd.f32 %v1079_v36, %v1078_v43 }
 0x238   : > { %v1539_v32 = vpop.eup %1538  ;;  %v1025_v33 = vmul.f32 0.6931472, %v1537_v27  ;;  %1546 = vlog2.f32 %v1050_v21  ;;  %v917_v1 = vadd.f32 1.0, %v916_v44  ;;  %v1046_v3 = vmul.f32 %v1978_v63, %v1045_v34 }
 0x239   : > { %v1016_v40 = vmul.f32 0.6931472, %v1539_v32  ;;  %v1081_v48 = vsel %vm1067_vm12, %v1061_v37, 0.0  ;;  %vm1048_vm2 = vcmp.lt.f32.partialorder %v1047_v39, 0.0004427343  ;;  %v1266_v63 = vsel %vm867_vm1, 1.0, %v1615_v24 }
 0x23a   : > { %v1031_v45 = vsel %vm2011_vm3, %v1028_v29, %v1025_v33  ;;  %v1082_v62 = vadd.f32 %v1081_v48, %v1080_v55  ;;  %v1056_v50 = vand.u32 2147483647, %v2003_v17  ;;  %vm920_vm7 = vcmp.lt.f32.partialorder %v919_v60, 0.0004427343 }
 0x23b   : > { %v1541_v52 = vpop.eup %1540  ;;  %v1022_v53 = vsel %vm2017_vm4, %v1019_v42, %v1016_v40  ;;  %v1063_v59 = vmul.f32 %v1956_v47, %v1031_v45 }
 0x23c   : > { %v1034_v56 = vmul.f32 0.6931472, %v1541_v52  ;;  %v1062_v58 = vmul.f32 %v1953_v46, %v1022_v53  ;;  %v1054_v46 = vadd.f32 1.0, %v1053_v38  ;;  %vm1057_vm8 = vcmp.lt.f32.partialorder %v1056_v50, 0.0004427343 }
 0x23d   : > { %v1085_v7 = vsel %vm1067_vm12, %v1063_v59, 0.0 }
 0x23e   : > { %v1543_v0 = vpop.eup %1542  ;;  %v1040_v2 = vsel %vm1039_vm5, %v1037_v57, %v1034_v56  ;;  %v1083_v49 = vsel %vm1067_vm12, %v1062_v58, 0.0  ;;  %v1055_v16 = vmul.f32 %v2003_v17, %v1054_v46 }
 0x23f   : > { %v1043_v5 = vmul.f32 0.6931472, %v1543_v0  ;;  %v1064_v47 = vmul.f32 %v1964_v51, %v1040_v2  ;;  %v1084_v6 = vadd.f32 %v1083_v49, %v1082_v62  ;;  %v918_v51 = vmul.f32 %v1999_v13, %v917_v1 }
 0x241   : > { %v1545_v8 = vpop.eup %1544  ;;  %v1049_v9 = vsel %vm1048_vm2, %v1046_v3, %v1043_v5  ;;  %v1086_v10 = vadd.f32 %v1085_v7, %v1084_v6  ;;  %v1087_v14 = vsel %vm1067_vm12, %v1064_v47, 0.0 }
 0x242   : > { %v1547_v11 = vpop.eup %1546  ;;  %v915_v12 = vmul.f32 0.6931472, %v1545_v8  ;;  %v1065_v41 = vmul.f32 %v1274_v61, %v1049_v9 }
 0x243   : > { %v1052_v15 = vmul.f32 0.6931472, %v1547_v11  ;;  %v1088_v20 = vadd.f32 %v1087_v14, %v1086_v10 }
 0x244   : > { %v921_v18 = vsel %vm920_vm7, %v918_v51, %v915_v12  ;;  %v1089_v4 = vsel %vm1067_vm12, %v1065_v41, 0.0 }
 0x245   : > { %v922_v31 = vmul.f32 %v1266_v63, %v921_v18  ;;  %v1058_v19 = vsel %vm1057_vm8, %v1055_v16, %v1052_v15  ;;  %v1090_v13 = vadd.f32 %v1089_v4, %v1088_v20 }
 0x246   : > { %v1066_v22 = vmul.f32 %v1275_v54, %v1058_v19 }
 0x247   : > { %v1068_v23 = vsel %vm1067_vm12, %v922_v31, 0.0 }
 0x248   : > { %1069 = vadd.xlane.f32.xlu0 %v1068_v23  ;;  %v1091_v25 = vsel %vm1067_vm12, %v1066_v22, 0.0 }
 0x249   : > { %v1092_v21 = vadd.f32 %v1091_v25, %v1090_v13 }
 0x24b   : > { %1093 = vadd.xlane.f32.xlu1 %v1092_v21 }
 0x2d5   : > { %v1070_v24 = vpop.xlane.xlu0 %1069 }
 0x2d6   : > { %v1071_v26 = vrot.slane %v1070_v24, 4 }
 0x2d8   : > { %v1072_v17 = vadd.f32 %v1071_v26, %v1070_v24  ;;  %v1094_v27 = vpop.xlane.xlu1 %1093 }
 0x2d9   : > { %v1095_v28 = vrot.slane %v1094_v27, 4 }
 0x2da   : > { %v1073_v29 = vrot.slane %v1072_v17, 2 }
 0x2db   : > { %v1096_v30 = vadd.f32 %v1095_v28, %v1094_v27 }
 0x2dc   : > { %v1074_v32 = vadd.f32 %v1073_v29, %v1072_v17 }
 0x2dd   : > { %v1097_v33 = vrot.slane %v1096_v30, 2 }
 0x2de   : > { %v1075_v35 = vrot.slane %v1074_v32, 1 }
 0x2df   : > { %v1098_v37 = vadd.f32 %v1097_v33, %v1096_v30 }
 0x2e0   : > { %v1076_v40 = vadd.f32 %v1075_v35, %v1074_v32 }
 0x2e1   : > { %v1099_v42 = vrot.slane %v1098_v37, 1 }
 0x2e2   : > { %1463 = vpush %v1076_v40 }
 0x2e3   : > { %v1100_v34 = vadd.f32 %v1099_v42, %v1098_v37 }
 0x2e5   : > { %1465 = vpush %v1100_v34 }
 0x313   : > { %s1464_s18 = spop %1463 }
 0x316   : > { %s1466_s26 = spop %1465 }
 0x317   : > { %s1102_s28 = sadd.f32 %s1466_s26, %s1464_s18 }
 0x319   : > { %v1103_v43 = vstv %s1102_s28 }
 0x31a   : > { %1104 = vst [vmem:[%s287_s29] sm:$0xff] %v1103_v43 }
 0x31b   : > { %1561 = shalt.err (!%p1558_p4)
}
 0x31c   : > { %s1562_s9 = scalar_lea.hbm %s2066_s10, 128  ;;  %s1566_s18 = scalar_lea.hbm %s2114_s6, 512 }
 0x31d   : > { %p1563_p7 = scmp.ne.s32.totalorder %s2066_s10, %s1562_s9  ;;  %p1567_p10 = scmp.lt.u32.totalorder %s2066_s10, %s2114_s6 }
 0x31e   : > { %p1568_p11 = scmp.lt.u32.totalorder %s1566_s18, %s1562_s9  ;;  %p1570_p13 = scmp.lt.u32.totalorder %s1562_s9, %s2066_s10 }
 0x31f   : > { %p1564_p8 = pnand %p1563_p7, %p1690_p5 }
 0x320   : > { %p1569_p12 = por %p1568_p11, %p1567_p10 }
 0x321   : > { %p1565_p9 = pneg %p1564_p8 }
 0x322   : > { %p1571_p0 = por %p1570_p13, %p1569_p12 }
 0x324   : > { %p1572_p1 = pnand %p1571_p0, %p1565_p9 }
 0x326   : > { %1575 = shalt.err (!%p1572_p1)
}
 0x327   : > { %1467 = dma.vmem_to_hbm [thread:$0]  (%p1690_p5), %s2068_s19, 128, %s2066_s10, %s1106_s11  }
 0x328 PF: > { %p1473_p2 = scmp.ge.s32.totalorder %s1610_s24, 2  ;;  %s1131_s28 = sand.u32 1, %s1598_s21  }
 0x329   : > { %s1132_s20 = scalar_lea.sflag [#allocation3], %s1131_s28 }
 0x32a   : > { %p1470_p3 = pnand %p1473_p2, %p1694_p6 }
 0x32c   : > { %1593 = dma.done.wait (!%p1470_p3), %s1132_s20, 128  }
 0x32d   : > { %1595 = vsyncadd (!%p1470_p3), %s1132_s20, 4294967168  ;;  %p16_p4 = scmp.ge.s32.totalorder %s1677_s27, 6   ;;  %s2127_s21 = smov %s1602_s22 }
 0x32e   : > { %s2128_s22 = smov %s1606_s23  ;;  %s2129_s23 = smov %s1688_s30 }
 0x32f   : > { %s2130_s24 = smov %s1677_s27  ;;  %18 = sbr.rel (!%p16_p4) target bundleno = 3 (0x3), region = 88 }
 0x336   :  { %1137 = vsyncpa [#allocation3], 1 }
 0x337   :  { %1139 = vsyncpa [#allocation3 + $0x1], 1 }

</bundles_post_ra>
